<compile_context>
chip_gen: v6e
topology: v6e:2x2x1
jax: 0.10.0
libtpu: 0.0.40
codegen_flags: <defaults>
</compile_context>

<pallas_src>
import functools

import jax
import jax.numpy as jnp
from jax import lax
from jax.experimental import pallas as pl
from jax.experimental.pallas import tpu as pltpu


def _round_up(x: int, m: int) -> int:
    return (x + m - 1) // m * m


def _ce_label_smooth_kernel(x_ref, t_ref, o_ref, *, epsilon: float, n_total: int):
    """One (TILE_N, C) logits tile -> partial loss sum in an (8, 128) block."""
    x = x_ref[...].astype(jnp.float32)            # (TN, C) f32
    t = t_ref[...]                                # (TN, 1) int32
    tn, c = x.shape

    # Numerically stable row-wise logsumexp (exp accumulation stays in f32).
    m = jnp.max(x, axis=1, keepdims=True)                               # (TN, 1)
    lse = m + jnp.log(jnp.sum(jnp.exp(x - m), axis=1, keepdims=True))   # (TN, 1)

    # Fused smoothed-target weighted reduce on raw x:
    #   w_j = (1-eps)*1[j==t] + eps/C  (sums to 1)  ->  loss_i = lse_i - <w, x_i>
    col = lax.broadcasted_iota(jnp.int32, (tn, c), 1)                   # (TN, C)
    w = jnp.where(col == t, 1.0 - epsilon + epsilon / c, epsilon / c)   # (TN, C)
    row_dot = jnp.sum(w * x, axis=1, keepdims=True)                     # (TN, 1)
    loss_rows = lse - row_dot                                           # (TN, 1)

    def write(rows):
        partial = jnp.sum(rows)
        # Dense (1, 8, 128) block with the partial in exactly one slot and
        # zeros elsewhere: unmasked lane-dense store, and the wrapper's
        # partials.sum() is exact (adding zeros) with no strided gather.
        sub = lax.broadcasted_iota(jnp.int32, o_ref.shape, o_ref.ndim - 2)
        lane = lax.broadcasted_iota(jnp.int32, o_ref.shape, o_ref.ndim - 1)
        o_ref[...] = jnp.where((sub == 0) & (lane == 0), partial, 0.0)

    if n_total % tn == 0:
        # Every tile is full: no tail masking anywhere.
        write(loss_rows)
    else:
        is_last = pl.program_id(0) == pl.num_programs(0) - 1

        @pl.when(is_last)
        def _():
            # Padded rows hold unspecified data; mask with a select AFTER the
            # per-row loss (select does not propagate NaN/Inf from the
            # unselected branch).
            row = (pl.program_id(0) * tn
                   + lax.broadcasted_iota(jnp.int32, (tn, 1), 0))
            write(jnp.where(row < n_total, loss_rows, 0.0))

        @pl.when(jnp.logical_not(is_last))
        def _():
            write(loss_rows)


def _pick_tile_n(n: int, c: int, itemsize: int, vmem_bytes: int) -> int:
    # (1) Size by bytes: aim for ~4 MiB per logits block in its true HBM dtype
    #     (bf16 stays 2 B), so grid-step overhead (~0.35 us) is amortized and
    #     DMA bursts are long enough to hit the HBM roofline.
    target_block_bytes = 4 << 20
    rows = max(8, target_block_bytes // (c * itemsize))

    # (2) Cap so the double-buffered input block plus ~6 full-tile f32
    #     temporaries fit comfortably under the VMEM limit (vmem_bytes // 2).
    vmem_budget = vmem_bytes // 2
    per_row_bytes = c * (2 * itemsize + 6 * 4)
    rows = min(rows, max(8, vmem_budget // per_row_bytes))

    # (3) Never exceed the (padded) batch, and keep >= 2 grid tiles so the
    #     "parallel" batch axis actually splits across both v7x TensorCores
    #     (neutral on single-TC v5e/v6e).
    rows = min(rows, _round_up(n, 8))
    if n > 8:
        rows = min(rows, _round_up(pl.cdiv(n, 2), 8))

    return max(8, (rows // 8) * 8)


def cross_entropy_label_smooth(inputs: jax.Array,
                               targets: jax.Array,
                               epsilon: float) -> jax.Array:
    """inputs: (N, C) float logits; targets: (N,) int labels -> scalar f32."""
    n, c = inputs.shape
    t2d = targets.astype(jnp.int32).reshape(n, 1)

    try:
        vmem_bytes = int(pltpu.get_tpu_info().vmem_capacity_bytes)
    except Exception:
        vmem_bytes = 64 << 20   # conservative fallback (v7x-sized)

    tile_n = _pick_tile_n(n, c, jnp.dtype(inputs.dtype).itemsize, vmem_bytes)
    num_tiles = pl.cdiv(n, tile_n)

    kernel = functools.partial(_ce_label_smooth_kernel,
                               epsilon=float(epsilon), n_total=n)

    partials = pl.pallas_call(
        kernel,
        out_shape=jax.ShapeDtypeStruct((num_tiles, 8, 128), jnp.float32),
        grid=(num_tiles,),
        in_specs=[
            pl.BlockSpec((tile_n, c), lambda i: (i, 0)),
            pl.BlockSpec((tile_n, 1), lambda i: (i, 0)),
        ],
        out_specs=pl.BlockSpec((1, 8, 128), lambda i: (i, 0, 0)),
        compiler_params=pltpu.CompilerParams(
            dimension_semantics=("parallel",),
            vmem_limit_bytes=min(vmem_bytes // 2, 96 << 20),
        ),
    )(inputs, t2d)

    # Each tile's block holds its partial in one slot (zeros elsewhere), so a
    # dense contiguous sum is exact; finish the batch mean here.
    return partials.sum() / jnp.float32(n)


def _reference(inputs, targets, epsilon):
    # Pure-JAX reference mirroring the PyTorch module.
    log_probs = jax.nn.log_softmax(inputs.astype(jnp.float32), axis=1)
    _, c = inputs.shape
    onehot = jax.nn.one_hot(targets, c, dtype=jnp.float32)
    smooth = (1.0 - epsilon) * onehot + epsilon / c
    return (-smooth * log_probs).mean(0).sum()


if __name__ == "__main__":
    num_classes = 16
    batch = 8
    epsilon = 0.1

    key = jax.random.PRNGKey(0)
    k_x, k_t = jax.random.split(key)
    inputs = jax.random.normal(k_x, (batch, num_classes), dtype=jnp.float32)
    targets = jax.random.randint(k_t, (batch,), 0, num_classes, dtype=jnp.int32)

    loss = cross_entropy_label_smooth(inputs, targets, epsilon)
    loss = jax.block_until_ready(loss)

    ref = _reference(inputs, targets, epsilon)
    assert jnp.allclose(loss, ref, atol=1e-5, rtol=1e-5), (loss, ref)

    print("KERNEL_OK")
</pallas_src>

<mosaic_0001>
module attributes {stable_mosaic.version = 11 : i64} {
  func.func @_ce_label_smooth_kernel(%arg0: i32, %arg1: memref<8x16xf32, #tpu.memory_space<vmem>>, %arg2: memref<8x1xi32, #tpu.memory_space<vmem>>, %arg3: memref<1x8x128xf32, #tpu.memory_space<vmem>>) attributes {dimension_semantics = [#tpu.dimension_semantics<parallel>], iteration_bounds = array<i64: 1>, scalar_prefetch = 0 : i64, scratch_operands = 0 : i64, tpu.core_type = #tpu.core_type<tc>, window_params = [{transform_indices = @transform_0, window_bounds = array<i64: 8, 16>}, {transform_indices = @transform_1, window_bounds = array<i64: 8, 1>}, {transform_indices = @transform_2, window_bounds = array<i64: 1, 8, 128>}]} {
    %c0 = arith.constant 0 : index
    %c0_0 = arith.constant 0 : index
    %0 = vector.load %arg1[%c0, %c0_0] : memref<8x16xf32, #tpu.memory_space<vmem>>, vector<8x16xf32>
    %c0_1 = arith.constant 0 : index
    %c0_2 = arith.constant 0 : index
    %1 = vector.load %arg2[%c0_1, %c0_2] : memref<8x1xi32, #tpu.memory_space<vmem>>, vector<8x1xi32>
    %cst = arith.constant dense<0xFF800000> : vector<8xf32>
    %2 = vector.multi_reduction <maximumf>, %0, %cst [1] : vector<8x16xf32> to vector<8xf32>
    %3 = vector.shape_cast %2 : vector<8xf32> to vector<8x1xf32>
    %4 = vector.broadcast %3 : vector<8x1xf32> to vector<8x16xf32>
    %5 = arith.subf %0, %4 : vector<8x16xf32>
    %6 = math.exp %5 : vector<8x16xf32>
    %cst_3 = arith.constant dense<0.000000e+00> : vector<8xf32>
    %7 = vector.multi_reduction <add>, %6, %cst_3 [1] : vector<8x16xf32> to vector<8xf32>
    %8 = vector.shape_cast %7 : vector<8xf32> to vector<8x1xf32>
    %9 = math.log %8 : vector<8x1xf32>
    %10 = arith.addf %3, %9 : vector<8x1xf32>
    %11 = tpu.iota {dimensions = array<i32: 1>} : vector<8x16xi32>
    %12 = vector.broadcast %1 : vector<8x1xi32> to vector<8x16xi32>
    %13 = arith.cmpi eq, %11, %12 : vector<8x16xi32>
    %cst_4 = arith.constant 9.062500e-01 : f32
    %cst_5 = arith.constant 6.250000e-03 : f32
    %14 = vector.broadcast %cst_4 : f32 to vector<8x16xf32>
    %15 = vector.broadcast %cst_5 : f32 to vector<8x16xf32>
    %16 = arith.select %13, %14, %15 : vector<8x16xi1>, vector<8x16xf32>
    %17 = arith.mulf %16, %0 : vector<8x16xf32>
    %cst_6 = arith.constant dense<0.000000e+00> : vector<8xf32>
    %18 = vector.multi_reduction <add>, %17, %cst_6 [1] : vector<8x16xf32> to vector<8xf32>
    %19 = vector.shape_cast %18 : vector<8xf32> to vector<8x1xf32>
    %20 = arith.subf %10, %19 : vector<8x1xf32>
    %21 = vector.shape_cast %20 : vector<8x1xf32> to vector<1x8x1xf32>
    %cst_7 = arith.constant dense<0.000000e+00> : vector<1xf32>
    %22 = vector.multi_reduction <add>, %21, %cst_7 [1, 2] : vector<1x8x1xf32> to vector<1xf32>
    %23 = vector.shape_cast %22 : vector<1xf32> to vector<1x1x1xf32>
    %24 = vector.extract %23[0, 0, 0] : f32 from vector<1x1x1xf32>
    %25 = tpu.iota {dimensions = array<i32: 1>} : vector<1x8x128xi32>
    %26 = tpu.iota {dimensions = array<i32: 2>} : vector<1x8x128xi32>
    %c0_i32 = arith.constant 0 : i32
    %27 = vector.broadcast %c0_i32 : i32 to vector<1x8x128xi32>
    %28 = arith.cmpi eq, %25, %27 : vector<1x8x128xi32>
    %c0_i32_8 = arith.constant 0 : i32
    %29 = vector.broadcast %c0_i32_8 : i32 to vector<1x8x128xi32>
    %30 = arith.cmpi eq, %26, %29 : vector<1x8x128xi32>
    %31 = arith.andi %28, %30 : vector<1x8x128xi1>
    %cst_9 = arith.constant 0.000000e+00 : f32
    %32 = vector.broadcast %24 : f32 to vector<1x8x128xf32>
    %33 = vector.broadcast %cst_9 : f32 to vector<1x8x128xf32>
    %34 = arith.select %31, %32, %33 : vector<1x8x128xi1>, vector<1x8x128xf32>
    %c0_10 = arith.constant 0 : index
    %c0_11 = arith.constant 0 : index
    %c0_12 = arith.constant 0 : index
    %35 = vector.load %arg3[%c0_10, %c0_11, %c0_12] : memref<1x8x128xf32, #tpu.memory_space<vmem>>, vector<1x8x128xf32>
    tpu.vector_store %arg3[%c0_10, %c0_11, %c0_12], %34 {strides = array<i32>} : memref<1x8x128xf32, #tpu.memory_space<vmem>>, vector<1x8x128xf32>,
    return
  }
  func.func @transform_0(%arg0: i32) -> (i32, i32) {
    %c0_i32 = arith.constant 0 : i32
    %c0_i32_0 = arith.constant 0 : i32
    return %arg0, %c0_i32 : i32, i32
  }
  func.func @transform_1(%arg0: i32) -> (i32, i32) {
    %c0_i32 = arith.constant 0 : i32
    %c0_i32_0 = arith.constant 0 : i32
    return %arg0, %c0_i32 : i32, i32
  }
  func.func @transform_2(%arg0: i32) -> (i32, i32, i32) {
    %c0_i32 = arith.constant 0 : i32
    %c0_i32_0 = arith.constant 0 : i32
    %c0_i32_1 = arith.constant 0 : i32
    return %arg0, %c0_i32, %c0_i32_0 : i32, i32, i32
  }
}

</mosaic_0001>

<bundles_post_ra>
// kernel: tpu_custom_call.1
= control target key start
LH: loop header
LB: loop body
LE: loop exit
PB: predicated region body
PF: predicated region fallthrough
CT: control target
= control target key end

     0   :  { %vm14_vm0 = vcmask 130048   ;;  %s134_s0 = inlined_call_operand.vmem [shape: f32[8,16], index: 0, kind: input, shape index: {}]   ;;  %s135_s1 = inlined_call_operand.vmem [shape: s32[8,1], index: 1, kind: input, shape index: {}]   ;;  %s136_s2 = inlined_call_operand.hbm [shape: f32[1,8,128], index: 2, kind: output, shape index: {}]  }
   0x1   :  { %v12_v0 = vld [vmem:[%s134_s0] sm:$0xff] }
   0x2   :  { %7 = vsyncpa [#allocation3], 0  ;;  %v15_v1 = vsel %vm14_vm0, %v12_v0, -inf  ;;  %v104_v2 = vmov 0   ;;  %v13_v3 = vld [vmem:[%s135_s1] sm:$0xff]  ;;  %v27_v7 = vlaneseq  ;;  %vm39_vm2 = vcmask 7168  }
   0x3   :  { %77 = vset.pattern.permute.xlu0 %v104_v2  ;;  %v105_v10 = vmov 0.00625   ;;  %s106_s0 = smov [#allocation2]  }
   0x4   :  { %16 = vmax.xlane.f32.xlu0 %v15_v1  ;;  %v28_v8 = vand.u32 127, %v27_v7  ;;  %v51_v30 = vshrl.u32 %v27_v7, 7  ;;  %s64_s1 = sshll.u32 %s106_s0, 4  ;;  %s65_s1 = int_to_ptr.vmem [resolvable:$true] %s64_s1 }
   0x5   :  { %s82_s14 = scalar_lea.vmem %s65_s1, 128  ;;  %p87_p1 = scmp.lt.s32.totalorder %s65_s1, %s65_s1 }
   0x6   :  { %vm52_vm3 = vcmp.eq.s32.totalorder %v51_v30, 0  ;;  %vm53_vm4 = vcmp.eq.s32.totalorder %v28_v8, 0  ;;  %p83_p0 = scmp.ne.s32.totalorder %s65_s1, %s82_s14  ;;  %p88_p2 = scmp.lt.s32.totalorder %s82_s14, %s82_s14 }
   0x7   :  { %vm54_vm5 = vmand %vm52_vm3, %vm53_vm4 }
   0x8   :  { %p89_p3 = por %p88_p2, %p87_p1 }
   0xa   :  { %p90_p4 = pnand %p89_p3, %p83_p0 }
  0x1a   :  { %30 = vperm.xlu0 %77, %v13_v3  }
  0x8d   :  { %v17_v4 = vpop.xlane.xlu0 %16 }
  0x8e   :  { %v18_v5 = vsub.f32 %v12_v0, %v17_v4 }
  0x90   :  { %v19_v6 = vmul.f32 1.442695, %v18_v5 }
  0x92   :  { %78 = vpow2.f32 %v19_v6 }
  0x95   :  { %v31_v9 = vpop.permute.xlu0 %30 }
  0x96   :  { %vm32_vm1 = vcmp.eq.s32.totalorder %v28_v8, %v31_v9 }
  0x97   :  { %v33_v11 = vsel %vm32_vm1, 0.90625, %v105_v10 }
  0x98   :  { %v34_v12 = vmul.f32 %v33_v11, %v12_v0 }
  0x9a   :  { %v35_v15 = vsel %vm14_vm0, %v34_v12, 0.0 }
  0x9f   :  { %v79_v13 = vpop.eup %78 }
  0xa0   :  { %v21_v14 = vsel %vm14_vm0, %v79_v13, 0.0 }
  0xa1   :  { %22 = vadd.xlane.f32.xlu1 %v21_v14 }
  0xa5   :  { %36 = vadd.xlane.f32.xlu1 %v35_v15 }
 0x12a   :  { %v23_v16 = vpop.xlane.xlu1 %22 }
 0x12b   :  { %80 = vlog2.f32 %v23_v16 }
 0x12e   :  { %v37_v19 = vpop.xlane.xlu1 %36 }
 0x138   :  { %v81_v17 = vpop.eup %80 }
 0x139   :  { %v25_v18 = vmul.f32 0.6931472, %v81_v17 }
 0x13b   :  { %v26_v20 = vadd.f32 %v25_v18, %v17_v4 }
 0x13d   :  { %v38_v21 = vsub.f32 %v26_v20, %v37_v19 }
 0x13f   :  { %v40_v22 = vsel %vm39_vm2, %v38_v21, 0.0 }
 0x140   :  { %41 = vadd.xlane.f32.xlu1 %v40_v22 }
 0x1c9   :  { %v42_v23 = vpop.xlane.xlu1 %41 }
 0x1ca   :  { %v43_v24 = vrot.slane %v42_v23, 4 }
 0x1cc   :  { %v44_v25 = vadd.f32 %v43_v24, %v42_v23 }
 0x1ce   :  { %v45_v26 = vrot.slane %v44_v25, 2 }
 0x1d0   :  { %v46_v27 = vadd.f32 %v45_v26, %v44_v25 }
 0x1d2   :  { %v47_v28 = vrot.slane %v46_v27, 1 }
 0x1d4   :  { %v48_v29 = vadd.f32 %v47_v28, %v46_v27 }
 0x1d6   :  { %72 = vpush %v48_v29 }
 0x207   :  { %s73_s13 = spop %72 }
 0x208   :  { %v55_v31 = vstv %s73_s13 }
 0x209   :  { %v56_v32 = vsel %vm54_vm5, %v55_v31, 0.0 }
 0x20a   :  { %57 = vst [vmem:[#allocation2] sm:$0xff] %v56_v32 }
 0x20b   :  { %93 = shalt.err (!%p90_p4)
}
 0x20c   :  { %67 = dma.vmem_to_hbm [thread:$0]  %s65_s1, 128, %s136_s2, [#allocation3]  }
 0x20d   :  { %102 = dma.done.wait [#allocation3], 128  }
 0x20e   :  { %103 = vsyncadd [#allocation3], 4294967168 }
 0x20f   :  { %71 = vsyncpa [#allocation3], 1 }

</bundles_post_ra>
